<compile_context>
chip_gen: v7x
topology: tpu7x:2x2x1
jax: 0.10.0
libtpu: 0.0.40
codegen_flags: <defaults>
</compile_context>

<pallas_src>
import math

import jax
import jax.numpy as jnp
from jax.experimental import pallas as pl
from jax.experimental.pallas import tpu as pltpu


VMEM_LIMIT_BYTES = 48 * 1024 * 1024     # headroom under v7x's 64 MiB physical VMEM
FUSED_VMEM_BUDGET = 28 * 1024 * 1024    # take the fused path only when comfy in VMEM


def _round_up(x, m):
    return (x + m - 1) // m * m


def _pad2(a, rows, cols):
    return jnp.pad(a, ((0, rows - a.shape[0]), (0, cols - a.shape[1])))


def _prep_operands(x, adj, w1, b1, w2, b2, np_, dp):
    """Zero-pad to (np_, dp) and cast MXU operands to bf16 (semantics preserved:
    padded rows/cols of adj, x and W are zero; padded bias lanes are zero)."""
    n, d = x.shape
    x_p = _pad2(x, np_, dp).astype(jnp.float32)               # f32 (residual source)
    adj_bf = _pad2(adj, np_, np_).astype(jnp.bfloat16)
    w1_bf = _pad2(w1, dp, dp).astype(jnp.bfloat16)
    w2_bf = _pad2(w2, dp, dp).astype(jnp.bfloat16)
    b1_p = jnp.pad(b1, (0, dp - d)).reshape(1, dp).astype(jnp.float32)
    b2_p = jnp.pad(b2, (0, dp - d)).reshape(1, dp).astype(jnp.float32)
    return x_p, adj_bf, w1_bf, b1_p, w2_bf, b2_p


# ----------------------- FUSED single-call path ----------------------------

def _fused_gresblock_kernel(adj_ref, x_ref, w1_ref, b1_ref, w2_ref, b2_ref, o_ref):
    adj = adj_ref[...]                        # bf16 [Np, Np]
    x_f32 = x_ref[...]                        # f32  [Np, Dp] (residual)
    x_bf = x_f32.astype(jnp.bfloat16)

    # Layer 1: h = relu(A_hat @ (x @ W1) + b1)
    xw1 = jnp.dot(x_bf, w1_ref[...], preferred_element_type=jnp.float32)
    h = jnp.dot(adj, xw1.astype(jnp.bfloat16), preferred_element_type=jnp.float32)
    h = jnp.maximum(h + b1_ref[...], 0.0)

    # Layer 2: out = relu(A_hat @ (h @ W2) + b2 + x)
    xw2 = jnp.dot(h.astype(jnp.bfloat16), w2_ref[...], preferred_element_type=jnp.float32)
    out = jnp.dot(adj, xw2.astype(jnp.bfloat16), preferred_element_type=jnp.float32)
    o_ref[...] = jnp.maximum(out + b2_ref[...] + x_f32, 0.0).astype(o_ref.dtype)


def _fused_vmem_bytes(np_, dp):
    # rough upper bound: double-buffered pallas I/O + compiler temporaries
    io = 2 * np_ * np_ + 2 * 4 * np_ * dp + 2 * 2 * dp * dp + 2 * 4 * dp
    temps = 6 * np_ * dp * 4
    return 2 * io + temps


def _gresblock_fused(x, adj, w1, b1, w2, b2, *, np_, dp):
    x_p, adj_bf, w1_bf, b1_p, w2_bf, b2_p = _prep_operands(
        x, adj, w1, b1, w2, b2, np_, dp)

    cost = pl.CostEstimate(
        flops=int(4 * np_ * dp * (np_ + dp)),             # 2 aggregations + 2 transforms
        transcendentals=0,
        bytes_accessed=int(2 * np_ * np_                  # adj (bf16)
                           + 2 * 4 * np_ * dp             # x in + out (f32)
                           + 2 * 2 * dp * dp),            # weights (bf16)
    )

    def full_spec(shape):
        return pl.BlockSpec(shape, lambda i: (0,) * len(shape))

    return pl.pallas_call(
        _fused_gresblock_kernel,
        out_shape=jax.ShapeDtypeStruct((np_, dp), jnp.float32),
        grid_spec=pltpu.PrefetchScalarGridSpec(
            num_scalar_prefetch=0,
            grid=(1,),
            in_specs=[
                full_spec((np_, np_)),    # adj   (bf16)
                full_spec((np_, dp)),     # x     (f32)
                full_spec((dp, dp)),      # w1    (bf16)
                full_spec((1, dp)),       # b1    (f32)
                full_spec((dp, dp)),      # w2    (bf16)
                full_spec((1, dp)),       # b2    (f32)
            ],
            out_specs=full_spec((np_, dp)),
        ),
        compiler_params=pltpu.CompilerParams(
            dimension_semantics=("arbitrary",),
            vmem_limit_bytes=VMEM_LIMIT_BYTES,
        ),
        cost_estimate=cost,
    )(adj_bf, x_p, w1_bf, b1_p, w2_bf, b2_p)


# ----------------------- TILED streaming fallback ---------------------------

def _feature_transform_kernel(x_ref, w_ref, o_ref):
    # xw = x @ W  (bf16 in, f32 MXU accumulation, bf16 out for the next MXU op)
    o_ref[...] = jnp.dot(
        x_ref[...], w_ref[...], preferred_element_type=jnp.float32
    ).astype(o_ref.dtype)


def _make_aggregate_kernel(*, relu, has_res):
    """out = [relu]( A_hat @ xw + b [+ residual] ), tiled over (rows, K)."""

    def kernel(adj_ref, xw_ref, b_ref, *rest):
        if has_res:
            res_ref, o_ref, acc_ref = rest
        else:
            o_ref, acc_ref = rest

        k = pl.program_id(1)

        @pl.when(k == 0)
        def _():
            acc_ref[...] = jnp.zeros_like(acc_ref)

        # Pure MXU accumulate in the K loop (bias/ReLU only in epilogue).
        acc_ref[...] += jnp.dot(
            adj_ref[...], xw_ref[...], preferred_element_type=jnp.float32
        )

        @pl.when(k == pl.num_programs(1) - 1)
        def _():
            out = acc_ref[...] + b_ref[...]
            if has_res:
                out = out + res_ref[...].astype(jnp.float32)
            if relu:
                out = jnp.maximum(out, 0.0)
            o_ref[...] = out.astype(o_ref.dtype)

    return kernel


def _feature_transform(x_bf, w_bf, *, tm):
    np_, dp = x_bf.shape
    return pl.pallas_call(
        _feature_transform_kernel,
        out_shape=jax.ShapeDtypeStruct((np_, dp), jnp.bfloat16),
        grid_spec=pltpu.PrefetchScalarGridSpec(
            num_scalar_prefetch=0,
            grid=(np_ // tm,),
            in_specs=[
                pl.BlockSpec((tm, dp), lambda i: (i, 0)),
                pl.BlockSpec((dp, dp), lambda i: (0, 0)),
            ],
            out_specs=pl.BlockSpec((tm, dp), lambda i: (i, 0)),
        ),
        compiler_params=pltpu.CompilerParams(
            dimension_semantics=("parallel",),
            vmem_limit_bytes=VMEM_LIMIT_BYTES,
        ),
    )(x_bf, w_bf)


def _aggregate(adj_bf, xw_bf, bias_f32, residual_f32, *, relu, out_dtype, tm, tk):
    np_ = adj_bf.shape[0]
    dp = xw_bf.shape[1]
    grid = (np_ // tm, np_ // tk)

    has_res = residual_f32 is not None
    kernel = _make_aggregate_kernel(relu=relu, has_res=has_res)

    in_specs = [
        pl.BlockSpec((tm, tk), lambda i, k: (i, k)),   # adj tile (bf16)
        pl.BlockSpec((tk, dp), lambda i, k: (k, 0)),   # xw K-slab (bf16)
        pl.BlockSpec((1, dp), lambda i, k: (0, 0)),    # bias (f32)
    ]
    args = [adj_bf, xw_bf, bias_f32]
    if has_res:
        in_specs.append(pl.BlockSpec((tm, dp), lambda i, k: (i, 0)))  # residual (f32)
        args.append(residual_f32)

    out_itemsize = 2 if out_dtype == jnp.bfloat16 else 4
    cost = pl.CostEstimate(
        flops=2 * np_ * np_ * dp,
        transcendentals=0,
        bytes_accessed=int(
            np_ * np_ * 2                      # adj (bf16)
            + (np_ // tm) * np_ * dp * 2       # xw re-read per row tile (bf16)
            + np_ * dp * out_itemsize          # output
        ),
    )

    return pl.pallas_call(
        kernel,
        out_shape=jax.ShapeDtypeStruct((np_, dp), out_dtype),
        grid_spec=pltpu.PrefetchScalarGridSpec(
            num_scalar_prefetch=0,
            grid=grid,
            in_specs=in_specs,
            out_specs=pl.BlockSpec((tm, dp), lambda i, k: (i, 0)),
            scratch_shapes=[pltpu.VMEM((tm, dp), jnp.float32)],
        ),
        compiler_params=pltpu.CompilerParams(
            dimension_semantics=("parallel", "arbitrary"),
            vmem_limit_bytes=VMEM_LIMIT_BYTES,
        ),
        cost_estimate=cost,
    )(*args)


def _gresblock_tiled(x, adj, w1, b1, w2, b2, *, np_, dp, tm, tk):
    x_p, adj_bf, w1_bf, b1_p, w2_bf, b2_p = _prep_operands(
        x, adj, w1, b1, w2, b2, np_, dp)
    x_bf = x_p.astype(jnp.bfloat16)

    # Layer 1: h = relu(A_hat @ (x @ W1) + b1)   (h kept bf16 for next MXU op)
    xw1 = _feature_transform(x_bf, w1_bf, tm=tm)
    h = _aggregate(adj_bf, xw1, b1_p, None, relu=True,
                   out_dtype=jnp.bfloat16, tm=tm, tk=tk)

    # Layer 2: out = relu(A_hat @ (h @ W2) + b2 + x)
    xw2 = _feature_transform(h, w2_bf, tm=tm)
    out = _aggregate(adj_bf, xw2, b2_p, x_p, relu=True,
                     out_dtype=jnp.float32, tm=tm, tk=tk)
    return out


# ------------------------------ dispatcher ----------------------------------

def gresblock_pallas(x, adj, w1, b1, w2, b2, *, tm=256, tk=256):
    """relu(GCNConv2(relu(GCNConv1(x))) + x) with dense normalized adj."""
    n, d = x.shape
    dp = _round_up(d, 128)                 # lane-dense feature dim

    np_fused = _round_up(n, 128)
    if _fused_vmem_bytes(np_fused, dp) <= FUSED_VMEM_BUDGET:
        out = _gresblock_fused(x, adj, w1, b1, w2, b2, np_=np_fused, dp=dp)
    else:
        np_tiled = _round_up(n, math.lcm(tm, tk))
        out = _gresblock_tiled(x, adj, w1, b1, w2, b2,
                               np_=np_tiled, dp=dp, tm=tm, tk=tk)
    return out[:n, :d]


# ------------------------------- JAX glue ----------------------------------

def normalized_dense_adj(edge_index, num_nodes):
    """Dense A_hat = D^{-1/2}(A + I)D^{-1/2}, matching PyG gcn_norm.

    edge_index: int array [2, E] with rows (src, dst); messages flow src->dst.
    """
    # TODO(synk): scatter-add adjacency construction stays in plain JAX (no clean
    # Pallas dense-scatter equivalent worth writing for this graph glue).
    src, dst = edge_index[0], edge_index[1]
    loop = jnp.arange(num_nodes, dtype=edge_index.dtype)
    src = jnp.concatenate([src, loop])
    dst = jnp.concatenate([dst, loop])
    a = jnp.zeros((num_nodes, num_nodes), jnp.float32).at[dst, src].add(1.0)
    deg = a.sum(axis=1)
    dis = jnp.where(deg > 0, 1.0 / jnp.sqrt(deg), 0.0)
    return dis[:, None] * a * dis[None, :]


def gresblock_ref(x, adj, w1, b1, w2, b2):
    """Pure-JAX reference with the same bf16 MXU-operand / f32 accumulate path."""
    def dot(a, b):
        return jnp.dot(a.astype(jnp.bfloat16), b.astype(jnp.bfloat16),
                       preferred_element_type=jnp.float32)

    h = jnp.maximum(dot(adj, dot(x, w1)) + b1, 0.0)
    h2 = dot(adj, dot(h, w2)) + b2
    return jnp.maximum(h2 + x, 0.0)


# --------------------------------- main -------------------------------------

if __name__ == "__main__":
    N, D = 16, 32  # num_nodes, feature dim (GResBlock(dim=32))

    key = jax.random.PRNGKey(0)
    kx, kw1, kw2, kb1, kb2 = jax.random.split(key, 5)

    scale = 1.0 / jnp.sqrt(jnp.float32(D))
    x = jax.random.normal(kx, (N, D), jnp.float32)
    w1 = jax.random.normal(kw1, (D, D), jnp.float32) * scale
    w2 = jax.random.normal(kw2, (D, D), jnp.float32) * scale
    b1 = jax.random.normal(kb1, (D,), jnp.float32) * 0.01
    b2 = jax.random.normal(kb2, (D,), jnp.float32) * 0.01

    # Deterministic graph: bidirectional ring over N nodes -> edge_index [2, 2N]
    i = jnp.arange(N, dtype=jnp.int32)
    src = jnp.concatenate([i, (i + 1) % N])
    dst = jnp.concatenate([(i + 1) % N, i])
    edge_index = jnp.stack([src, dst], axis=0)

    adj = normalized_dense_adj(edge_index, N)

    gres = jax.jit(gresblock_pallas)
    out = gres(x, adj, w1, b1, w2, b2)
    out = jax.block_until_ready(out)

    ref = gresblock_ref(x, adj, w1, b1, w2, b2)
    assert out.shape == (N, D)
    assert jnp.allclose(out, ref, atol=1e-3, rtol=1e-3), "mismatch vs JAX reference"

    print("KERNEL_OK")
</pallas_src>

<mosaic_0001>
module attributes {stable_mosaic.version = 11 : i64} {
  func.func @_fused_gresblock_kernel(%arg0: i32, %arg1: memref<128x128xbf16, #tpu.memory_space<vmem>>, %arg2: memref<128x128xf32, #tpu.memory_space<vmem>>, %arg3: memref<128x128xbf16, #tpu.memory_space<vmem>>, %arg4: memref<1x128xf32, #tpu.memory_space<vmem>>, %arg5: memref<128x128xbf16, #tpu.memory_space<vmem>>, %arg6: memref<1x128xf32, #tpu.memory_space<vmem>>, %arg7: memref<128x128xf32, #tpu.memory_space<vmem>>) attributes {dimension_semantics = [#tpu.dimension_semantics<arbitrary>], iteration_bounds = array<i64: 1>, scalar_prefetch = 0 : i64, scratch_operands = 0 : i64, tpu.core_type = #tpu.core_type<tc>, window_params = [{pipeline_mode = #tpu.pipeline_mode<synchronous>, transform_indices = @transform_0, window_bounds = array<i64: 128, 128>}, {pipeline_mode = #tpu.pipeline_mode<synchronous>, transform_indices = @transform_1, window_bounds = array<i64: 128, 128>}, {pipeline_mode = #tpu.pipeline_mode<synchronous>, transform_indices = @transform_2, window_bounds = array<i64: 128, 128>}, {pipeline_mode = #tpu.pipeline_mode<synchronous>, transform_indices = @transform_3, window_bounds = array<i64: 1, 128>}, {pipeline_mode = #tpu.pipeline_mode<synchronous>, transform_indices = @transform_4, window_bounds = array<i64: 128, 128>}, {pipeline_mode = #tpu.pipeline_mode<synchronous>, transform_indices = @transform_5, window_bounds = array<i64: 1, 128>}, {pipeline_mode = #tpu.pipeline_mode<synchronous>, transform_indices = @transform_6, window_bounds = array<i64: 128, 128>}]} {
    %c0 = arith.constant 0 : index
    %c0_0 = arith.constant 0 : index
    %0 = vector.load %arg1[%c0, %c0_0] : memref<128x128xbf16, #tpu.memory_space<vmem>>, vector<128x128xbf16>
    %c0_1 = arith.constant 0 : index
    %c0_2 = arith.constant 0 : index
    %1 = vector.load %arg2[%c0_1, %c0_2] : memref<128x128xf32, #tpu.memory_space<vmem>>, vector<128x128xf32>
    %2 = arith.truncf %1 : vector<128x128xf32> to vector<128x128xbf16>
    %c0_3 = arith.constant 0 : index
    %c0_4 = arith.constant 0 : index
    %3 = vector.load %arg3[%c0_3, %c0_4] : memref<128x128xbf16, #tpu.memory_space<vmem>>, vector<128x128xbf16>
    %cst = arith.constant dense<0.000000e+00> : vector<128x128xf32>
    %4 = tpu.matmul %2, %3, %cst {dimension_numbers = #tpu.dot_dimension_numbers<[1], [0], [0], [1], [0, 0, 1, 1], [], []>} : vector<128x128xbf16>, vector<128x128xbf16>, vector<128x128xf32> -> vector<128x128xf32>
    %5 = arith.truncf %4 : vector<128x128xf32> to vector<128x128xbf16>
    %cst_5 = arith.constant dense<0.000000e+00> : vector<128x128xf32>
    %6 = tpu.matmul %0, %5, %cst_5 {dimension_numbers = #tpu.dot_dimension_numbers<[1], [0], [0], [1], [0, 0, 1, 1], [], []>} : vector<128x128xbf16>, vector<128x128xbf16>, vector<128x128xf32> -> vector<128x128xf32>
    %c0_6 = arith.constant 0 : index
    %c0_7 = arith.constant 0 : index
    %7 = vector.load %arg4[%c0_6, %c0_7] : memref<1x128xf32, #tpu.memory_space<vmem>>, vector<1x128xf32>
    %8 = vector.broadcast %7 : vector<1x128xf32> to vector<128x128xf32>
    %9 = arith.addf %6, %8 : vector<128x128xf32>
    %cst_8 = arith.constant 0.000000e+00 : f32
    %10 = vector.broadcast %cst_8 : f32 to vector<128x128xf32>
    %11 = arith.maximumf %9, %10 : vector<128x128xf32>
    %12 = arith.truncf %11 : vector<128x128xf32> to vector<128x128xbf16>
    %c0_9 = arith.constant 0 : index
    %c0_10 = arith.constant 0 : index
    %13 = vector.load %arg5[%c0_9, %c0_10] : memref<128x128xbf16, #tpu.memory_space<vmem>>, vector<128x128xbf16>
    %cst_11 = arith.constant dense<0.000000e+00> : vector<128x128xf32>
    %14 = tpu.matmul %12, %13, %cst_11 {dimension_numbers = #tpu.dot_dimension_numbers<[1], [0], [0], [1], [0, 0, 1, 1], [], []>} : vector<128x128xbf16>, vector<128x128xbf16>, vector<128x128xf32> -> vector<128x128xf32>
    %15 = arith.truncf %14 : vector<128x128xf32> to vector<128x128xbf16>
    %cst_12 = arith.constant dense<0.000000e+00> : vector<128x128xf32>
    %16 = tpu.matmul %0, %15, %cst_12 {dimension_numbers = #tpu.dot_dimension_numbers<[1], [0], [0], [1], [0, 0, 1, 1], [], []>} : vector<128x128xbf16>, vector<128x128xbf16>, vector<128x128xf32> -> vector<128x128xf32>
    %c0_13 = arith.constant 0 : index
    %c0_14 = arith.constant 0 : index
    %17 = vector.load %arg6[%c0_13, %c0_14] : memref<1x128xf32, #tpu.memory_space<vmem>>, vector<1x128xf32>
    %18 = vector.broadcast %17 : vector<1x128xf32> to vector<128x128xf32>
    %19 = arith.addf %16, %18 : vector<128x128xf32>
    %20 = arith.addf %19, %1 : vector<128x128xf32>
    %cst_15 = arith.constant 0.000000e+00 : f32
    %21 = vector.broadcast %cst_15 : f32 to vector<128x128xf32>
    %22 = arith.maximumf %20, %21 : vector<128x128xf32>
    %c0_16 = arith.constant 0 : index
    %c0_17 = arith.constant 0 : index
    %23 = vector.load %arg7[%c0_16, %c0_17] : memref<128x128xf32, #tpu.memory_space<vmem>>, vector<128x128xf32>
    tpu.vector_store %arg7[%c0_16, %c0_17], %22 {strides = array<i32>} : memref<128x128xf32, #tpu.memory_space<vmem>>, vector<128x128xf32>,
    return
  }
  func.func @transform_0(%arg0: i32) -> (i32, i32) {
    %c0_i32 = arith.constant 0 : i32
    %c0_i32_0 = arith.constant 0 : i32
    %c0_i32_1 = arith.constant 0 : i32
    return %c0_i32, %c0_i32_0 : i32, i32
  }
  func.func @transform_1(%arg0: i32) -> (i32, i32) {
    %c0_i32 = arith.constant 0 : i32
    %c0_i32_0 = arith.constant 0 : i32
    %c0_i32_1 = arith.constant 0 : i32
    return %c0_i32, %c0_i32_0 : i32, i32
  }
  func.func @transform_2(%arg0: i32) -> (i32, i32) {
    %c0_i32 = arith.constant 0 : i32
    %c0_i32_0 = arith.constant 0 : i32
    %c0_i32_1 = arith.constant 0 : i32
    return %c0_i32, %c0_i32_0 : i32, i32
  }
  func.func @transform_3(%arg0: i32) -> (i32, i32) {
    %c0_i32 = arith.constant 0 : i32
    %c0_i32_0 = arith.constant 0 : i32
    %c0_i32_1 = arith.constant 0 : i32
    return %c0_i32, %c0_i32_0 : i32, i32
  }
  func.func @transform_4(%arg0: i32) -> (i32, i32) {
    %c0_i32 = arith.constant 0 : i32
    %c0_i32_0 = arith.constant 0 : i32
    %c0_i32_1 = arith.constant 0 : i32
    return %c0_i32, %c0_i32_0 : i32, i32
  }
  func.func @transform_5(%arg0: i32) -> (i32, i32) {
    %c0_i32 = arith.constant 0 : i32
    %c0_i32_0 = arith.constant 0 : i32
    %c0_i32_1 = arith.constant 0 : i32
    return %c0_i32, %c0_i32_0 : i32, i32
  }
  func.func @transform_6(%arg0: i32) -> (i32, i32) {
    %c0_i32 = arith.constant 0 : i32
    %c0_i32_0 = arith.constant 0 : i32
    %c0_i32_1 = arith.constant 0 : i32
    return %c0_i32, %c0_i32_0 : i32, i32
  }
}

</mosaic_0001>

<bundles_post_ra>
// kernel: gresblock_pallas.1
= control target key start
LH: loop header
LB: loop body
LE: loop exit
PB: predicated region body
PF: predicated region fallthrough
CT: control target
= control target key end

     0   :  { %s1299_s2 = inlined_call_operand.vmem [shape: bf16[128,128], index: 2, kind: input, shape index: {}]   ;;  %s1300_s1 = inlined_call_operand.vmem [shape: f32[128,128], index: 1, kind: input, shape index: {}]   ;;  %s1301_s0 = inlined_call_operand.vmem [shape: bf16[128,128], index: 0, kind: input, shape index: {}]   ;;  %s1302_s4 = inlined_call_operand.vmem [shape: bf16[128,128], index: 4, kind: input, shape index: {}]   ;;  %s1303_s3 = inlined_call_operand.vmem [shape: f32[1,128], index: 3, kind: input, shape index: {}]   ;;  %s1304_s5 = inlined_call_operand.vmem [shape: f32[1,128], index: 5, kind: input, shape index: {}]   ;;  %s1305_s6 = inlined_call_operand.vmem [shape: f32[128,128], index: 6, kind: output, shape index: {}]  }
   0x1   :  { %v952_v0 = vld [vmem:[%s1299_s2] sm:$0xff]   ;;  %v953_v1 = vld [vmem:[%s1299_s2 + $0x8] sm:$0xff]   ;;  %v954_v2 = vld [vmem:[%s1299_s2 + $0x10] sm:$0xff]  }
   0x2   :  { %824 = vmatprep.subr.bf16.mxu0 %v952_v0  ;;  %v955_v3 = vld [vmem:[%s1299_s2 + $0x18] sm:$0xff]   ;;  %v1026_v4 = vld [vmem:[%s1300_s1] sm:$0xff]  ;;  %v1031_v5 = vld [vmem:[%s1300_s1 + $0x8] sm:$0xff] }
   0x3   :  { %825 = vmatpush3.bf16.msra.mxu0 %v952_v0  ;;  %v56_v6 = vpack.c.bf16 %v1031_v5, %v1026_v4  ;;  %v956_v7 = vld [vmem:[%s1299_s2 + $0x20] sm:$0xff]   ;;  %v957_v8 = vld [vmem:[%s1299_s2 + $0x28] sm:$0xff]   ;;  %v958_v9 = vld [vmem:[%s1299_s2 + $0x30] sm:$0xff]  }
   0x4   :  { %826 = vmatprep.subr.bf16.mxu0 %v953_v1  ;;  %v959_v10 = vld [vmem:[%s1299_s2 + $0x38] sm:$0xff]   ;;  %v1050_v11 = vld [vmem:[%s1300_s1 + $0x10] sm:$0xff]  ;;  %v1060_v13 = vld [vmem:[%s1300_s1 + $0x20] sm:$0xff] }
   0x5   :  { %840 = vmatprep.mubr.bf16.mxu0 %v56_v6  ;;  %v1055_v12 = vld [vmem:[%s1300_s1 + $0x18] sm:$0xff]  ;;  %v1065_v14 = vld [vmem:[%s1300_s1 + $0x28] sm:$0xff]  ;;  %v1074_v17 = vld [vmem:[%s1300_s1 + $0x30] sm:$0xff] }
   0x6   :  { %v57_v15 = vpack.c.bf16 %v1055_v12, %v1050_v11  ;;  %v58_v16 = vpack.c.bf16 %v1065_v14, %v1060_v13  ;;  %v1079_v18 = vld [vmem:[%s1300_s1 + $0x38] sm:$0xff]  ;;  %v1084_v19 = vld [vmem:[%s1300_s1 + $0x40] sm:$0xff]  ;;  %v1089_v20 = vld [vmem:[%s1300_s1 + $0x48] sm:$0xff] }
   0x7   :  { %827 = vmatpush3.bf16.msra.mxu0 %v953_v1  ;;  %v59_v21 = vpack.c.bf16 %v1079_v18, %v1074_v17  ;;  %v60_v22 = vpack.c.bf16 %v1089_v20, %v1084_v19  ;;  %v1098_v23 = vld [vmem:[%s1300_s1 + $0x50] sm:$0xff]  ;;  %v1103_v24 = vld [vmem:[%s1300_s1 + $0x58] sm:$0xff]  ;;  %v1108_v25 = vld [vmem:[%s1300_s1 + $0x60] sm:$0xff] }
   0x8   :  { %828 = vmatprep.subr.bf16.mxu0 %v954_v2  ;;  %v1113_v26 = vld [vmem:[%s1300_s1 + $0x68] sm:$0xff]  ;;  %v61_v27 = vpack.c.bf16 %v1103_v24, %v1098_v23  ;;  %v1122_v29 = vld [vmem:[%s1300_s1 + $0x70] sm:$0xff]  ;;  %v1127_v30 = vld [vmem:[%s1300_s1 + $0x78] sm:$0xff] }
   0x9   :  { %v62_v28 = vpack.c.bf16 %v1113_v26, %v1108_v25  ;;  %v63_v31 = vpack.c.bf16 %v1127_v30, %v1122_v29  ;;  %v1134_v32 = vld [vmem:[%s1301_s0] sm:$0xff]   ;;  %v969_v34 = vld [vmem:[%s1302_s4 + $0x8] sm:$0xff]   ;;  %v970_v35 = vld [vmem:[%s1302_s4 + $0x10] sm:$0xff]  }
   0xa   :  { %872 = vmatprep.mubr.bf16.mxu1 %v1134_v32  ;;  %v968_v33 = vld [vmem:[%s1302_s4] sm:$0xff]   ;;  %v971_v36 = vld [vmem:[%s1302_s4 + $0x18] sm:$0xff]   ;;  %v973_v38 = vld [vmem:[%s1302_s4 + $0x28] sm:$0xff]  }
   0xb   :  { %829 = vmatpush3.bf16.msra.mxu0 %v954_v2  ;;  %v972_v37 = vld [vmem:[%s1302_s4 + $0x20] sm:$0xff]   ;;  %v1158_v63 = vld [vmem:[%s1301_s0 + $0x8] sm:$0xff]   ;;  %v1163_v0 = vld [vmem:[%s1301_s0 + $0x10] sm:$0xff]  }
   0xc   :  { %830 = vmatprep.subr.bf16.mxu0 %v955_v3  ;;  %v1170_v1 = vld [vmem:[%s1301_s0 + $0x18] sm:$0xff]   ;;  %v1175_v2 = vld [vmem:[%s1301_s0 + $0x20] sm:$0xff]   ;;  %v1187_v6 = vld [vmem:[%s1301_s0 + $0x30] sm:$0xff]  }
   0xf   :  { %831 = vmatpush3.bf16.msra.mxu0 %v955_v3  ;;  %v1182_v3 = vld [vmem:[%s1301_s0 + $0x28] sm:$0xff]  }
  0x10   :  { %832 = vmatprep.subr.bf16.mxu0 %v956_v7 }
  0x13   :  { %833 = vmatpush3.bf16.msra.mxu0 %v956_v7  ;;  %v1194_v7 = vld [vmem:[%s1301_s0 + $0x38] sm:$0xff]  }
  0x14   :  { %834 = vmatprep.subr.bf16.mxu0 %v957_v8 }
  0x17   :  { %835 = vmatpush3.bf16.msra.mxu0 %v957_v8  ;;  %v974_v8 = vld [vmem:[%s1302_s4 + $0x30] sm:$0xff]  }
  0x18   :  { %836 = vmatprep.subr.bf16.mxu0 %v958_v9 }
  0x1b   :  { %837 = vmatpush3.bf16.msra.mxu0 %v958_v9  ;;  %v975_v9 = vld [vmem:[%s1302_s4 + $0x38] sm:$0xff]  }
  0x1c   :  { %838 = vmatprep.subr.bf16.mxu0 %v959_v10 }
  0x1f   :  { %839 = vmatpush3.bf16.msra.mxu0 %v959_v10  ;;  %v742_v10 = vld [vmem:[%s1303_s3] ss:$0 sm:$0xff] }
  0x20   :  { %888 = vmatprep.subr.bf16.mxu0 %v968_v33 }
  0x22   :  { %841 = vmatmul.mubr.bf16.vlgmr.msra.gmra.mrb[0].mxu0 %v57_v15 }
  0x23   :  { %844 = vmatprep.mubr.bf16.mxu0 %v58_v16  ;;  %889 = vmatpush3.bf16.msra.mxu0 %v968_v33 }
  0x24   :  { %890 = vmatprep.subr.bf16.mxu0 %v969_v34 }
  0x27   :  { %891 = vmatpush3.bf16.msra.mxu0 %v969_v34 }
  0x28   :  { %892 = vmatprep.subr.bf16.mxu0 %v970_v35 }
  0x2a   :  { %845 = vmatmul.mubr.bf16.gmra.mrb[4].mxu0 %v59_v21 }
  0x2b   :  { %848 = vmatprep.mubr.bf16.mxu0 %v60_v22  ;;  %893 = vmatpush3.bf16.msra.mxu0 %v970_v35 }
  0x2c   :  { %894 = vmatprep.subr.bf16.mxu0 %v971_v36 }
  0x2f   :  { %895 = vmatpush3.bf16.msra.mxu0 %v971_v36 }
  0x30   :  { %896 = vmatprep.subr.bf16.mxu0 %v972_v37 }
  0x32   :  { %849 = vmatmul.mubr.bf16.gmra.mrb[8].mxu0 %v61_v27 }
  0x33   :  { %852 = vmatprep.mubr.bf16.mxu0 %v62_v28  ;;  %897 = vmatpush3.bf16.msra.mxu0 %v972_v37 }
  0x34   :  { %898 = vmatprep.subr.bf16.mxu0 %v973_v38 }
  0x37   :  { %899 = vmatpush3.bf16.msra.mxu0 %v973_v38 }
  0x38   :  { %900 = vmatprep.subr.bf16.mxu0 %v974_v8 }
  0x3a   :  { %853 = vmatmul.mubr.bf16.gmra.mrb[12].mxu0 %v63_v31 }
  0x3b   :  { %901 = vmatpush3.bf16.msra.mxu0 %v974_v8 }
  0x3c   :  { %902 = vmatprep.subr.bf16.mxu0 %v975_v9 }
  0x3f   :  { %903 = vmatpush3.bf16.msra.mxu0 %v975_v9 }
  0xf5   :  { %v842_v39 = vpop.f32.mrb[0].mxu0 }
  0xf6   :  { %v162_v40 = vpop.f32.mrb[1].mxu0 }
  0xf7   :  { %v843_v41 = vpop.f32.mrb[2].mxu0 }
  0xf8   :  { %v226_v42 = vpack.c.bf16 %v843_v41, %v842_v39  ;;  %v165_v43 = vpop.f32.mrb[3].mxu0 }
  0xf9   :  { %v225_v44 = vpack.c.bf16 %v165_v43, %v162_v40 }
  0xfb   :  { %856 = vmatprep.subr.bf16.mxu1 %v225_v44 }
  0xfc   :  { %857 = vmatpush3.bf16.msra.mxu1 %v225_v44 }
  0xfd   :  { %v846_v45 = vpop.f32.mrb[4].mxu0  ;;  %858 = vmatprep.subr.bf16.mxu1 %v226_v42 }
  0xfe   :  { %v178_v46 = vpop.f32.mrb[5].mxu0 }
  0xff   :  { %v847_v47 = vpop.f32.mrb[6].mxu0 }
 0x100   :  { %v228_v48 = vpack.c.bf16 %v847_v47, %v846_v45  ;;  %v181_v49 = vpop.f32.mrb[7].mxu0  ;;  %859 = vmatpush3.bf16.msra.mxu1 %v226_v42 }
 0x101   :  { %v227_v50 = vpack.c.bf16 %v181_v49, %v178_v46 }
 0x103   :  { %860 = vmatprep.subr.bf16.mxu1 %v227_v50 }
 0x104   :  { %861 = vmatpush3.bf16.msra.mxu1 %v227_v50 }
 0x105   :  { %v850_v51 = vpop.f32.mrb[8].mxu0  ;;  %862 = vmatprep.subr.bf16.mxu1 %v228_v48 }
 0x106   :  { %v194_v52 = vpop.f32.mrb[9].mxu0 }
 0x107   :  { %v851_v53 = vpop.f32.mrb[10].mxu0 }
 0x108   :  { %v230_v54 = vpack.c.bf16 %v851_v53, %v850_v51  ;;  %v197_v55 = vpop.f32.mrb[11].mxu0  ;;  %863 = vmatpush3.bf16.msra.mxu1 %v228_v48 }
 0x109   :  { %v229_v56 = vpack.c.bf16 %v197_v55, %v194_v52 }
 0x10b   :  { %864 = vmatprep.subr.bf16.mxu1 %v229_v56 }
 0x10c   :  { %865 = vmatpush3.bf16.msra.mxu1 %v229_v56 }
 0x10d   :  { %v854_v57 = vpop.f32.mrb[12].mxu0  ;;  %866 = vmatprep.subr.bf16.mxu1 %v230_v54 }
 0x10e   :  { %v210_v58 = vpop.f32.mrb[13].mxu0 }
 0x10f   :  { %v855_v59 = vpop.f32.mrb[14].mxu0 }
 0x110   :  { %v232_v60 = vpack.c.bf16 %v855_v59, %v854_v57  ;;  %v213_v61 = vpop.f32.mrb[15].mxu0  ;;  %867 = vmatpush3.bf16.msra.mxu1 %v230_v54 }
 0x111   :  { %v231_v62 = vpack.c.bf16 %v213_v61, %v210_v58 }
 0x113   :  { %868 = vmatprep.subr.bf16.mxu1 %v231_v62 }
 0x114   :  { %869 = vmatpush3.bf16.msra.mxu1 %v231_v62 }
 0x115   :  { %870 = vmatprep.subr.bf16.mxu1 %v232_v60 }
 0x118   :  { %871 = vmatpush3.bf16.msra.mxu1 %v232_v60 }
 0x11b   :  { %873 = vmatmul.mubr.bf16.vlgmr.msra.gmra.mrb[0].mxu1 %v1158_v63 }
 0x11c   :  { %876 = vmatprep.mubr.bf16.mxu1 %v1163_v0 }
 0x123   :  { %877 = vmatmul.mubr.bf16.gmra.mrb[4].mxu1 %v1170_v1 }
 0x124   :  { %880 = vmatprep.mubr.bf16.mxu1 %v1175_v2 }
 0x12b   :  { %881 = vmatmul.mubr.bf16.gmra.mrb[8].mxu1 %v1182_v3 }
 0x12c   :  { %884 = vmatprep.mubr.bf16.mxu1 %v1187_v6 }
 0x133   :  { %885 = vmatmul.mubr.bf16.gmra.mrb[12].mxu1 %v1194_v7 }
 0x134   :  { %936 = vmatprep.mubr.bf16.mxu1 %v1134_v32 }
 0x1ee   :  { %v874_v15 = vpop.f32.mrb[0].mxu1 }
 0x1ef   :  { %v331_v16 = vadd.f32 %v874_v15, %v742_v10  ;;  %v322_v21 = vpop.f32.mrb[1].mxu1 }
 0x1f0   :  { %v323_v22 = vadd.f32 %v742_v10, %v322_v21  ;;  %v875_v27 = vpop.f32.mrb[2].mxu1 }
 0x1f1   :  { %v334_v28 = vadd.f32 %v875_v27, %v742_v10  ;;  %v325_v31 = vpop.f32.mrb[3].mxu1  ;;  %v387_v33 = vmax.f32 %v331_v16, 0.0 }
 0x1f2   :  { %v326_v32 = vadd.f32 %v742_v10, %v325_v31  ;;  %v385_v35 = vmax.f32 %v323_v22, 0.0 }
 0x1f3   :  { %v388_v34 = vmax.f32 %v334_v28, 0.0 }
 0x1f4   :  { %v386_v36 = vmax.f32 %v326_v32, 0.0 }
 0x1f5   :  { %v402_v37 = vpack.c.bf16 %v388_v34, %v387_v33 }
 0x1f6   :  { %v401_v38 = vpack.c.bf16 %v386_v36, %v385_v35  ;;  %v878_v39 = vpop.f32.mrb[4].mxu1 }
 0x1f7   :  { %v347_v40 = vadd.f32 %v878_v39, %v742_v10  ;;  %v338_v41 = vpop.f32.mrb[5].mxu1 }
 0x1f8   :  { %v339_v42 = vadd.f32 %v742_v10, %v338_v41  ;;  %v879_v43 = vpop.f32.mrb[6].mxu1  ;;  %904 = vmatprep.mubr.bf16.mxu0 %v401_v38 }
 0x1f9   :  { %v350_v44 = vadd.f32 %v879_v43, %v742_v10  ;;  %v341_v45 = vpop.f32.mrb[7].mxu1  ;;  %905 = vmatmul.mubr.bf16.vlgmr.msra.gmra.mrb[16].mxu0 %v402_v37  ;;  %v391_v47 = vmax.f32 %v347_v40, 0.0 }
 0x1fa   :  { %v342_v46 = vadd.f32 %v742_v10, %v341_v45  ;;  %v389_v49 = vmax.f32 %v339_v42, 0.0 }
 0x1fb   :  { %v392_v48 = vmax.f32 %v350_v44, 0.0 }
 0x1fc   :  { %v390_v50 = vmax.f32 %v342_v46, 0.0 }
 0x1fd   :  { %v404_v51 = vpack.c.bf16 %v392_v48, %v391_v47 }
 0x1fe   :  { %v403_v52 = vpack.c.bf16 %v390_v50, %v389_v49  ;;  %v882_v53 = vpop.f32.mrb[8].mxu1 }
 0x1ff   :  { %v363_v54 = vadd.f32 %v882_v53, %v742_v10  ;;  %v354_v55 = vpop.f32.mrb[9].mxu1 }
 0x200   :  { %v355_v56 = vadd.f32 %v742_v10, %v354_v55  ;;  %v883_v57 = vpop.f32.mrb[10].mxu1  ;;  %908 = vmatprep.mubr.bf16.mxu0 %v403_v52 }
 0x201   :  { %v366_v58 = vadd.f32 %v883_v57, %v742_v10  ;;  %v357_v59 = vpop.f32.mrb[11].mxu1  ;;  %909 = vmatmul.mubr.bf16.gmra.mrb[20].mxu0 %v404_v51  ;;  %v395_v61 = vmax.f32 %v363_v54, 0.0 }
 0x202   :  { %v358_v60 = vadd.f32 %v742_v10, %v357_v59  ;;  %v393_v8 = vmax.f32 %v355_v56, 0.0 }
 0x203   :  { %v396_v62 = vmax.f32 %v366_v58, 0.0 }
 0x204   :  { %v394_v9 = vmax.f32 %v358_v60, 0.0 }
 0x205   :  { %v406_v15 = vpack.c.bf16 %v396_v62, %v395_v61 }
 0x206   :  { %v405_v16 = vpack.c.bf16 %v394_v9, %v393_v8  ;;  %v886_v21 = vpop.f32.mrb[12].mxu1  ;;  %v1217_v9 = vld [vmem:[%s1304_s5] ss:$0 sm:$0xff] }
 0x207   :  { %v379_v22 = vadd.f32 %v886_v21, %v742_v10  ;;  %v370_v27 = vpop.f32.mrb[13].mxu1 }
 0x208   :  { %v371_v28 = vadd.f32 %v742_v10, %v370_v27  ;;  %v887_v31 = vpop.f32.mrb[14].mxu1  ;;  %912 = vmatprep.mubr.bf16.mxu0 %v405_v16 }
 0x209   :  { %v382_v32 = vadd.f32 %v887_v31, %v742_v10  ;;  %v373_v33 = vpop.f32.mrb[15].mxu1  ;;  %913 = vmatmul.mubr.bf16.gmra.mrb[24].mxu0 %v406_v15  ;;  %v399_v35 = vmax.f32 %v379_v22, 0.0 }
 0x20a   :  { %v374_v34 = vadd.f32 %v742_v10, %v373_v33  ;;  %v397_v37 = vmax.f32 %v371_v28, 0.0 }
 0x20b   :  { %v400_v36 = vmax.f32 %v382_v32, 0.0 }
 0x20c   :  { %v398_v38 = vmax.f32 %v374_v34, 0.0 }
 0x20d   :  { %v408_v39 = vpack.c.bf16 %v400_v36, %v399_v35 }
 0x20e   :  { %v407_v40 = vpack.c.bf16 %v398_v38, %v397_v37 }
 0x210   :  { %916 = vmatprep.mubr.bf16.mxu0 %v407_v40 }
 0x211   :  { %917 = vmatmul.mubr.bf16.gmra.mrb[28].mxu0 %v408_v39 }
 0x2cc   :  { %v906_v41 = vpop.f32.mrb[16].mxu0 }
 0x2cd   :  { %v507_v42 = vpop.f32.mrb[17].mxu0 }
 0x2ce   :  { %v907_v43 = vpop.f32.mrb[18].mxu0 }
 0x2cf   :  { %v571_v44 = vpack.c.bf16 %v907_v43, %v906_v41  ;;  %v510_v45 = vpop.f32.mrb[19].mxu0 }
 0x2d0   :  { %v570_v46 = vpack.c.bf16 %v510_v45, %v507_v42 }
 0x2d2   :  { %920 = vmatprep.subr.bf16.mxu1 %v570_v46 }
 0x2d3   :  { %921 = vmatpush3.bf16.msra.mxu1 %v570_v46 }
 0x2d4   :  { %v910_v47 = vpop.f32.mrb[20].mxu0  ;;  %922 = vmatprep.subr.bf16.mxu1 %v571_v44 }
 0x2d5   :  { %v523_v48 = vpop.f32.mrb[21].mxu0 }
 0x2d6   :  { %v911_v10 = vpop.f32.mrb[22].mxu0 }
 0x2d7   :  { %v573_v49 = vpack.c.bf16 %v911_v10, %v910_v47  ;;  %v526_v50 = vpop.f32.mrb[23].mxu0  ;;  %923 = vmatpush3.bf16.msra.mxu1 %v571_v44 }
 0x2d8   :  { %v572_v51 = vpack.c.bf16 %v526_v50, %v523_v48 }
 0x2da   :  { %924 = vmatprep.subr.bf16.mxu1 %v572_v51 }
 0x2db   :  { %925 = vmatpush3.bf16.msra.mxu1 %v572_v51 }
 0x2dc   :  { %v914_v52 = vpop.f32.mrb[24].mxu0  ;;  %926 = vmatprep.subr.bf16.mxu1 %v573_v49 }
 0x2dd   :  { %v539_v53 = vpop.f32.mrb[25].mxu0 }
 0x2de   :  { %v915_v54 = vpop.f32.mrb[26].mxu0 }
 0x2df   :  { %v575_v55 = vpack.c.bf16 %v915_v54, %v914_v52  ;;  %v542_v56 = vpop.f32.mrb[27].mxu0  ;;  %927 = vmatpush3.bf16.msra.mxu1 %v573_v49 }
 0x2e0   :  { %v574_v57 = vpack.c.bf16 %v542_v56, %v539_v53 }
 0x2e2   :  { %928 = vmatprep.subr.bf16.mxu1 %v574_v57 }
 0x2e3   :  { %929 = vmatpush3.bf16.msra.mxu1 %v574_v57 }
 0x2e4   :  { %v918_v58 = vpop.f32.mrb[28].mxu0  ;;  %930 = vmatprep.subr.bf16.mxu1 %v575_v55 }
 0x2e5   :  { %v555_v59 = vpop.f32.mrb[29].mxu0 }
 0x2e6   :  { %v919_v60 = vpop.f32.mrb[30].mxu0 }
 0x2e7   :  { %v577_v61 = vpack.c.bf16 %v919_v60, %v918_v58  ;;  %v558_v62 = vpop.f32.mrb[31].mxu0  ;;  %931 = vmatpush3.bf16.msra.mxu1 %v575_v55 }
 0x2e8   :  { %v576_v8 = vpack.c.bf16 %v558_v62, %v555_v59 }
 0x2ea   :  { %932 = vmatprep.subr.bf16.mxu1 %v576_v8 }
 0x2eb   :  { %933 = vmatpush3.bf16.msra.mxu1 %v576_v8 }
 0x2ec   :  { %934 = vmatprep.subr.bf16.mxu1 %v577_v61 }
 0x2ef   :  { %935 = vmatpush3.bf16.msra.mxu1 %v577_v61 }
 0x2f2   :  { %937 = vmatmul.mubr.bf16.vlgmr.msra.gmra.mrb[16].mxu1 %v1158_v63 }
 0x2f3   :  { %940 = vmatprep.mubr.bf16.mxu1 %v1163_v0 }
 0x2fa   :  { %941 = vmatmul.mubr.bf16.gmra.mrb[20].mxu1 %v1170_v1 }
 0x2fb   :  { %944 = vmatprep.mubr.bf16.mxu1 %v1175_v2 }
 0x302   :  { %945 = vmatmul.mubr.bf16.gmra.mrb[24].mxu1 %v1182_v3 }
 0x303   :  { %948 = vmatprep.mubr.bf16.mxu1 %v1187_v6 }
 0x30a   :  { %949 = vmatmul.mubr.bf16.gmra.mrb[28].mxu1 %v1194_v7 }
 0x3c5   :  { %v938_v15 = vpop.f32.mrb[16].mxu1 }
 0x3c6   :  { %v628_v63 = vadd.f32 %v938_v15, %v1217_v9  ;;  %v619_v16 = vpop.f32.mrb[17].mxu1 }
 0x3c7   :  { %v620_v0 = vadd.f32 %v1217_v9, %v619_v16  ;;  %v939_v1 = vpop.f32.mrb[18].mxu1 }
 0x3c8   :  { %v684_v2 = vadd.f32 %v628_v63, %v1050_v11  ;;  %v631_v3 = vadd.f32 %v939_v1, %v1217_v9  ;;  %v622_v21 = vpop.f32.mrb[19].mxu1 }
 0x3c9   :  { %v682_v6 = vadd.f32 %v620_v0, %v1026_v4  ;;  %v623_v7 = vadd.f32 %v1217_v9, %v622_v21 }
 0x3ca   :  { %v700_v22 = vmax.f32 %v684_v2, 0.0  ;;  %v685_v27 = vadd.f32 %v631_v3, %v1055_v12 }
 0x3cb   :  { %v698_v28 = vmax.f32 %v682_v6, 0.0  ;;  %v683_v31 = vadd.f32 %v623_v7, %v1031_v5 }
 0x3cc   :  { %716 = vst [vmem:[%s1305_s6 + $0x10] sm:$0xff] %v700_v22  ;;  %v701_v32 = vmax.f32 %v685_v27, 0.0 }
 0x3cd   :  { %714 = vst [vmem:[%s1305_s6] sm:$0xff] %v698_v28  ;;  %v699_v11 = vmax.f32 %v683_v31, 0.0  ;;  %v942_v33 = vpop.f32.mrb[20].mxu1 }
 0x3ce   :  { %717 = vst [vmem:[%s1305_s6 + $0x18] sm:$0xff] %v701_v32  ;;  %v644_v4 = vadd.f32 %v942_v33, %v1217_v9  ;;  %v635_v12 = vpop.f32.mrb[21].mxu1 }
 0x3cf   :  { %715 = vst [vmem:[%s1305_s6 + $0x8] sm:$0xff] %v699_v11  ;;  %v636_v5 = vadd.f32 %v1217_v9, %v635_v12  ;;  %v943_v34 = vpop.f32.mrb[22].mxu1 }
 0x3d0   :  { %v688_v35 = vadd.f32 %v644_v4, %v1074_v17  ;;  %v647_v36 = vadd.f32 %v943_v34, %v1217_v9  ;;  %v638_v37 = vpop.f32.mrb[23].mxu1 }
 0x3d1   :  { %v686_v38 = vadd.f32 %v636_v5, %v1060_v13  ;;  %v639_v39 = vadd.f32 %v1217_v9, %v638_v37 }
 0x3d2   :  { %v704_v40 = vmax.f32 %v688_v35, 0.0  ;;  %v689_v41 = vadd.f32 %v647_v36, %v1079_v18 }
 0x3d3   :  { %v702_v42 = vmax.f32 %v686_v38, 0.0  ;;  %v687_v43 = vadd.f32 %v639_v39, %v1065_v14 }
 0x3d4   :  { %720 = vst [vmem:[%s1305_s6 + $0x30] sm:$0xff] %v704_v40  ;;  %v705_v44 = vmax.f32 %v689_v41, 0.0 }
 0x3d5   :  { %718 = vst [vmem:[%s1305_s6 + $0x20] sm:$0xff] %v702_v42  ;;  %v703_v17 = vmax.f32 %v687_v43, 0.0  ;;  %v946_v45 = vpop.f32.mrb[24].mxu1 }
 0x3d6   :  { %721 = vst [vmem:[%s1305_s6 + $0x38] sm:$0xff] %v705_v44  ;;  %v660_v13 = vadd.f32 %v946_v45, %v1217_v9  ;;  %v651_v18 = vpop.f32.mrb[25].mxu1 }
 0x3d7   :  { %719 = vst [vmem:[%s1305_s6 + $0x28] sm:$0xff] %v703_v17  ;;  %v652_v14 = vadd.f32 %v1217_v9, %v651_v18  ;;  %v947_v46 = vpop.f32.mrb[26].mxu1 }
 0x3d8   :  { %v692_v47 = vadd.f32 %v660_v13, %v1098_v23  ;;  %v663_v48 = vadd.f32 %v947_v46, %v1217_v9  ;;  %v654_v10 = vpop.f32.mrb[27].mxu1 }
 0x3d9   :  { %v690_v49 = vadd.f32 %v652_v14, %v1084_v19  ;;  %v655_v50 = vadd.f32 %v1217_v9, %v654_v10 }
 0x3da   :  { %v708_v51 = vmax.f32 %v692_v47, 0.0  ;;  %v693_v52 = vadd.f32 %v663_v48, %v1103_v24 }
 0x3db   :  { %v706_v53 = vmax.f32 %v690_v49, 0.0  ;;  %v691_v54 = vadd.f32 %v655_v50, %v1089_v20 }
 0x3dc   :  { %724 = vst [vmem:[%s1305_s6 + $0x50] sm:$0xff] %v708_v51  ;;  %v709_v55 = vmax.f32 %v693_v52, 0.0 }
 0x3dd   :  { %722 = vst [vmem:[%s1305_s6 + $0x40] sm:$0xff] %v706_v53  ;;  %v707_v23 = vmax.f32 %v691_v54, 0.0  ;;  %v950_v56 = vpop.f32.mrb[28].mxu1 }
 0x3de   :  { %725 = vst [vmem:[%s1305_s6 + $0x58] sm:$0xff] %v709_v55  ;;  %v676_v19 = vadd.f32 %v950_v56, %v1217_v9  ;;  %v667_v24 = vpop.f32.mrb[29].mxu1 }
 0x3df   :  { %723 = vst [vmem:[%s1305_s6 + $0x48] sm:$0xff] %v707_v23  ;;  %v668_v20 = vadd.f32 %v1217_v9, %v667_v24  ;;  %v951_v57 = vpop.f32.mrb[30].mxu1 }
 0x3e0   :  { %v696_v58 = vadd.f32 %v676_v19, %v1122_v29  ;;  %v679_v59 = vadd.f32 %v951_v57, %v1217_v9  ;;  %v670_v60 = vpop.f32.mrb[31].mxu1 }
 0x3e1   :  { %v694_v61 = vadd.f32 %v668_v20, %v1108_v25  ;;  %v671_v62 = vadd.f32 %v1217_v9, %v670_v60 }
 0x3e2   :  { %v712_v8 = vmax.f32 %v696_v58, 0.0  ;;  %v697_v15 = vadd.f32 %v679_v59, %v1127_v30 }
 0x3e3   :  { %v710_v63 = vmax.f32 %v694_v61, 0.0  ;;  %v695_v16 = vadd.f32 %v671_v62, %v1113_v26 }
 0x3e4   :  { %728 = vst [vmem:[%s1305_s6 + $0x70] sm:$0xff] %v712_v8  ;;  %v713_v0 = vmax.f32 %v697_v15, 0.0 }
 0x3e5   :  { %726 = vst [vmem:[%s1305_s6 + $0x60] sm:$0xff] %v710_v63  ;;  %v711_v29 = vmax.f32 %v695_v16, 0.0 }
 0x3e6   :  { %729 = vst [vmem:[%s1305_s6 + $0x78] sm:$0xff] %v713_v0 }
 0x3e7   :  { %727 = vst [vmem:[%s1305_s6 + $0x68] sm:$0xff] %v711_v29 }

</bundles_post_ra>
